<compile_context>
chip_gen: v7x
topology: tpu7x:2x2x1
jax: 0.10.0
libtpu: 0.0.40
codegen_flags: <defaults>
</compile_context>

<pallas_src>
import functools

import jax
import jax.numpy as jnp
from jax.experimental import pallas as pl
from jax.experimental.pallas import tpu as pltpu

EPS = 1e-5
_LP = 8  # left margin (sublane-aligned) of the padded scratch


# ---------------------------------------------------------------------------
# Fused kernel: one image (H, W) per grid step, everything stays in VMEM.
# ---------------------------------------------------------------------------
def _bottleneck_kernel(x_ref, s1_ref, b1_ref, w1_ref, b2_ref, w2_ref,
                       o_ref, hp_ref, *, H, W, Cin, Cmid, G):
    # ---- BN1 + ReLU, 1x1 conv (BN2 scale folded into w1), BN2 shift + ReLU
    xb = x_ref[...]                                   # (1, H, W, Cin)
    x2d = xb.reshape(H * W, Cin)
    a = jnp.maximum(x2d * s1_ref[...] + b1_ref[...], 0.0)
    h = jnp.dot(a, w1_ref[...], preferred_element_type=jnp.float32)
    h = jnp.maximum(h + b2_ref[...], 0.0)             # (H*W, Cmid)

    # ---- zero-padded copy of h in VMEM scratch (pad=1 for the 3x3 conv).
    # The image sits at rows [1, H] and columns [_LP, _LP+W); the sublane
    # offset _LP is a multiple of 8 so this store is aligned.  Rows 0/H+1 and
    # columns _LP-1/_LP+W stay zero from the fill below.
    hp_ref[...] = jnp.zeros_like(hp_ref)
    hp_ref[1:H + 1, _LP:_LP + W, :] = h.reshape(H, W, Cmid)

    # ---- 3x3 conv as 9 shifted matmuls accumulated in f32.
    # (At these channel counts the kernel is memory-bound, not MXU-bound; see
    # module TODO for the K=3*Cmid folding used at production channel counts.)
    acc = jnp.zeros((H * W, G), dtype=jnp.float32)
    for dy in range(3):
        for dx in range(3):
            c0 = _LP - 1 + dx
            patch = hp_ref[dy:dy + H, c0:c0 + W, :]   # (H, W, Cmid)
            acc = acc + jnp.dot(patch.reshape(H * W, Cmid), w2_ref[dy, dx],
                                preferred_element_type=jnp.float32)

    # ---- write [conv_out | x] straight into the concatenated output slab.
    o_ref[:, :, :, :G] = acc.reshape(1, H, W, G)
    o_ref[:, :, :, G:] = xb


def bottleneck_fused(x_nhwc, s1, b1, w1s, b2, w2t):
    N, H, W, Cin = x_nhwc.shape
    Cmid = w1s.shape[1]
    G = w2t.shape[-1]
    kernel = functools.partial(_bottleneck_kernel,
                               H=H, W=W, Cin=Cin, Cmid=Cmid, G=G)
    return pl.pallas_call(
        kernel,
        out_shape=jax.ShapeDtypeStruct((N, H, W, G + Cin), jnp.float32),
        grid=(N,),
        in_specs=[
            pl.BlockSpec((1, H, W, Cin), lambda n: (n, 0, 0, 0)),
            pl.BlockSpec((1, Cin), lambda n: (0, 0)),
            pl.BlockSpec((1, Cin), lambda n: (0, 0)),
            pl.BlockSpec((Cin, Cmid), lambda n: (0, 0)),
            pl.BlockSpec((1, Cmid), lambda n: (0, 0)),
            pl.BlockSpec((3, 3, Cmid, G), lambda n: (0, 0, 0, 0)),
        ],
        out_specs=pl.BlockSpec((1, H, W, G + Cin), lambda n: (n, 0, 0, 0)),
        scratch_shapes=[
            # padded activation buffer (per-core scratch; re-filled each step)
            pltpu.VMEM((H + 2, W + 2 * _LP, Cmid), jnp.float32),
        ],
        compiler_params=pltpu.CompilerParams(
            dimension_semantics=("parallel",)),
    )(x_nhwc, s1, b1, w1s, b2, w2t)


# ---------------------------------------------------------------------------
# Wrapper: NCHW <-> NHWC only at the API boundary; BN folding in tiny glue.
# ---------------------------------------------------------------------------
def bottleneck_forward(x_nchw, p):
    N, Cin, H, W = x_nchw.shape
    x = jnp.transpose(x_nchw, (0, 2, 3, 1))            # single relayout in

    # Inference-mode BN folded to per-channel scale/shift.
    s1 = p["g1"] / jnp.sqrt(p["v1"] + EPS)
    b1 = p["b1"] - p["m1"] * s1
    s2 = p["g2"] / jnp.sqrt(p["v2"] + EPS)
    b2 = p["b2"] - p["m2"] * s2

    w1 = jnp.transpose(p["w1"][:, :, 0, 0], (1, 0))     # (Cin, Cmid)
    w1s = w1 * s2[None, :]                              # fold BN2 scale
    Cmid = w1s.shape[1]
    w2t = jnp.transpose(p["w2"], (2, 3, 1, 0))          # OIHW -> (3,3,Cmid,G)

    out_nhwc = bottleneck_fused(
        x, s1.reshape(1, Cin), b1.reshape(1, Cin), w1s,
        b2.reshape(1, Cmid), w2t)                       # (N,H,W,G+Cin)
    return jnp.transpose(out_nhwc, (0, 3, 1, 2))        # single relayout out


# ---------------------------------------------------------------------------
# Pure-JAX reference (NCHW, mirrors torch eval-mode forward) for verification.
# ---------------------------------------------------------------------------
def bottleneck_reference(x, p):
    def bn(y, g, b, m, v):
        g, b, m, v = (t[None, :, None, None] for t in (g, b, m, v))
        return (y - m) / jnp.sqrt(v + EPS) * g + b

    a1 = jax.nn.relu(bn(x, p["g1"], p["b1"], p["m1"], p["v1"]))
    h = jax.lax.conv_general_dilated(
        a1, p["w1"], (1, 1), "VALID",
        dimension_numbers=("NCHW", "OIHW", "NCHW"))
    a2 = jax.nn.relu(bn(h, p["g2"], p["b2"], p["m2"], p["v2"]))
    o = jax.lax.conv_general_dilated(
        a2, p["w2"], (1, 1), ((1, 1), (1, 1)),
        dimension_numbers=("NCHW", "OIHW", "NCHW"))
    return jnp.concatenate([o, x], axis=1)


if __name__ == "__main__":
    # Small shapes consistent with the module: in_planes=16, growth_rate=8.
    N, Cin, H, W = 2, 16, 8, 8
    growth = 8
    Cmid = 4 * growth

    key = jax.random.PRNGKey(0)
    ks = jax.random.split(key, 11)

    params = {
        # bn1 (in_planes)
        "g1": 1.0 + 0.1 * jax.random.normal(ks[0], (Cin,), jnp.float32),
        "b1": 0.1 * jax.random.normal(ks[1], (Cin,), jnp.float32),
        "m1": 0.05 * jax.random.normal(ks[2], (Cin,), jnp.float32),
        "v1": 0.5 + jnp.abs(jax.random.normal(ks[3], (Cin,), jnp.float32)),
        # conv1: (4*growth, in_planes, 1, 1), no bias
        "w1": 0.1 * jax.random.normal(ks[4], (Cmid, Cin, 1, 1), jnp.float32),
        # bn2 (4*growth)
        "g2": 1.0 + 0.1 * jax.random.normal(ks[5], (Cmid,), jnp.float32),
        "b2": 0.1 * jax.random.normal(ks[6], (Cmid,), jnp.float32),
        "m2": 0.05 * jax.random.normal(ks[7], (Cmid,), jnp.float32),
        "v2": 0.5 + jnp.abs(jax.random.normal(ks[8], (Cmid,), jnp.float32)),
        # conv2: (growth, 4*growth, 3, 3), no bias
        "w2": 0.1 * jax.random.normal(ks[9], (growth, Cmid, 3, 3), jnp.float32),
    }

    x = jax.random.normal(ks[10], (N, Cin, H, W), jnp.float32)

    fwd = jax.jit(bottleneck_forward)
    out = jax.block_until_ready(fwd(x, params))
    ref = jax.block_until_ready(bottleneck_reference(x, params))

    assert out.shape == (N, growth + Cin, H, W), out.shape
    assert jnp.allclose(out, ref, atol=1e-4, rtol=1e-4), float(
        jnp.max(jnp.abs(out - ref)))
    print("KERNEL_OK")
</pallas_src>

<mosaic_0001>
module attributes {stable_mosaic.version = 11 : i64} {
  func.func @_bottleneck_kernel(%arg0: i32, %arg1: memref<1x8x8x16xf32, #tpu.memory_space<vmem>>, %arg2: memref<1x16xf32, #tpu.memory_space<vmem>>, %arg3: memref<1x16xf32, #tpu.memory_space<vmem>>, %arg4: memref<16x32xf32, #tpu.memory_space<vmem>>, %arg5: memref<1x32xf32, #tpu.memory_space<vmem>>, %arg6: memref<3x3x32x8xf32, #tpu.memory_space<vmem>>, %arg7: memref<1x8x8x24xf32, #tpu.memory_space<vmem>>, %arg8: memref<10x24x32xf32, #tpu.memory_space<vmem>>) attributes {dimension_semantics = [#tpu.dimension_semantics<parallel>], iteration_bounds = array<i64: 2>, scalar_prefetch = 0 : i64, scratch_operands = 1 : i64, tpu.core_type = #tpu.core_type<tc>, window_params = [{transform_indices = @transform_0, window_bounds = array<i64: 1, 8, 8, 16>}, {pipeline_mode = #tpu.pipeline_mode<synchronous>, transform_indices = @transform_1, window_bounds = array<i64: 1, 16>}, {pipeline_mode = #tpu.pipeline_mode<synchronous>, transform_indices = @transform_2, window_bounds = array<i64: 1, 16>}, {pipeline_mode = #tpu.pipeline_mode<synchronous>, transform_indices = @transform_3, window_bounds = array<i64: 16, 32>}, {pipeline_mode = #tpu.pipeline_mode<synchronous>, transform_indices = @transform_4, window_bounds = array<i64: 1, 32>}, {pipeline_mode = #tpu.pipeline_mode<synchronous>, transform_indices = @transform_5, window_bounds = array<i64: 3, 3, 32, 8>}, {transform_indices = @transform_6, window_bounds = array<i64: 1, 8, 8, 24>}]} {
    %c0 = arith.constant 0 : index
    %c0_0 = arith.constant 0 : index
    %c0_1 = arith.constant 0 : index
    %c0_2 = arith.constant 0 : index
    %0 = vector.load %arg1[%c0, %c0_0, %c0_1, %c0_2] : memref<1x8x8x16xf32, #tpu.memory_space<vmem>>, vector<1x8x8x16xf32>
    %1 = vector.shape_cast %0 : vector<1x8x8x16xf32> to vector<64x16xf32>
    %c0_3 = arith.constant 0 : index
    %c0_4 = arith.constant 0 : index
    %2 = vector.load %arg2[%c0_3, %c0_4] : memref<1x16xf32, #tpu.memory_space<vmem>>, vector<1x16xf32>
    %3 = vector.broadcast %2 : vector<1x16xf32> to vector<64x16xf32>
    %4 = arith.mulf %1, %3 : vector<64x16xf32>
    %c0_5 = arith.constant 0 : index
    %c0_6 = arith.constant 0 : index
    %5 = vector.load %arg3[%c0_5, %c0_6] : memref<1x16xf32, #tpu.memory_space<vmem>>, vector<1x16xf32>
    %6 = vector.broadcast %5 : vector<1x16xf32> to vector<64x16xf32>
    %7 = arith.addf %4, %6 : vector<64x16xf32>
    %cst = arith.constant 0.000000e+00 : f32
    %8 = vector.broadcast %cst : f32 to vector<64x16xf32>
    %9 = arith.maximumf %7, %8 : vector<64x16xf32>
    %c0_7 = arith.constant 0 : index
    %c0_8 = arith.constant 0 : index
    %10 = vector.load %arg4[%c0_7, %c0_8] : memref<16x32xf32, #tpu.memory_space<vmem>>, vector<16x32xf32>
    %cst_9 = arith.constant dense<0.000000e+00> : vector<64x32xf32>
    %11 = tpu.matmul %9, %10, %cst_9 {dimension_numbers = #tpu.dot_dimension_numbers<[1], [0], [0], [1], [0, 0, 1, 1], [], []>} : vector<64x16xf32>, vector<16x32xf32>, vector<64x32xf32> -> vector<64x32xf32>
    %c0_10 = arith.constant 0 : index
    %c0_11 = arith.constant 0 : index
    %12 = vector.load %arg5[%c0_10, %c0_11] : memref<1x32xf32, #tpu.memory_space<vmem>>, vector<1x32xf32>
    %13 = vector.broadcast %12 : vector<1x32xf32> to vector<64x32xf32>
    %14 = arith.addf %11, %13 : vector<64x32xf32>
    %cst_12 = arith.constant 0.000000e+00 : f32
    %15 = vector.broadcast %cst_12 : f32 to vector<64x32xf32>
    %16 = arith.maximumf %14, %15 : vector<64x32xf32>
    %cst_13 = arith.constant 0.000000e+00 : f32
    %17 = vector.broadcast %cst_13 : f32 to vector<10x24x32xf32>
    %c0_14 = arith.constant 0 : index
    %c0_15 = arith.constant 0 : index
    %c0_16 = arith.constant 0 : index
    %18 = vector.load %arg8[%c0_14, %c0_15, %c0_16] : memref<10x24x32xf32, #tpu.memory_space<vmem>>, vector<10x24x32xf32>
    tpu.vector_store %arg8[%c0_14, %c0_15, %c0_16], %17 {strides = array<i32>} : memref<10x24x32xf32, #tpu.memory_space<vmem>>, vector<10x24x32xf32>,
    %19 = vector.shape_cast %16 : vector<64x32xf32> to vector<8x8x32xf32>
    %c1 = arith.constant 1 : index
    %c8 = arith.constant 8 : index
    %c0_17 = arith.constant 0 : index
    %20 = vector.load %arg8[%c1, %c8, %c0_17] : memref<10x24x32xf32, #tpu.memory_space<vmem>>, vector<8x8x32xf32>
    tpu.vector_store %arg8[%c1, %c8, %c0_17], %19 {strides = array<i32>} : memref<10x24x32xf32, #tpu.memory_space<vmem>>, vector<8x8x32xf32>,
    %cst_18 = arith.constant 0.000000e+00 : f32
    %21 = vector.broadcast %cst_18 : f32 to vector<64x8xf32>
    %c0_19 = arith.constant 0 : index
    %c7 = arith.constant 7 : index
    %c0_20 = arith.constant 0 : index
    %22 = vector.load %arg8[%c0_19, %c7, %c0_20] : memref<10x24x32xf32, #tpu.memory_space<vmem>>, vector<8x8x32xf32>
    %23 = vector.shape_cast %22 : vector<8x8x32xf32> to vector<64x32xf32>
    %c0_21 = arith.constant 0 : index
    %c0_22 = arith.constant 0 : index
    %c0_23 = arith.constant 0 : index
    %c0_24 = arith.constant 0 : index
    %24 = vector.load %arg6[%c0_21, %c0_22, %c0_23, %c0_24] : memref<3x3x32x8xf32, #tpu.memory_space<vmem>>, vector<1x1x32x8xf32>
    %25 = vector.shape_cast %24 : vector<1x1x32x8xf32> to vector<32x8xf32>
    %cst_25 = arith.constant dense<0.000000e+00> : vector<64x8xf32>
    %26 = tpu.matmul %23, %25, %cst_25 {dimension_numbers = #tpu.dot_dimension_numbers<[1], [0], [0], [1], [0, 0, 1, 1], [], []>} : vector<64x32xf32>, vector<32x8xf32>, vector<64x8xf32> -> vector<64x8xf32>
    %27 = arith.addf %21, %26 : vector<64x8xf32>
    %c0_26 = arith.constant 0 : index
    %c8_27 = arith.constant 8 : index
    %c0_28 = arith.constant 0 : index
    %28 = vector.load %arg8[%c0_26, %c8_27, %c0_28] : memref<10x24x32xf32, #tpu.memory_space<vmem>>, vector<8x8x32xf32>
    %29 = vector.shape_cast %28 : vector<8x8x32xf32> to vector<64x32xf32>
    %c0_29 = arith.constant 0 : index
    %c1_30 = arith.constant 1 : index
    %c0_31 = arith.constant 0 : index
    %c0_32 = arith.constant 0 : index
    %30 = vector.load %arg6[%c0_29, %c1_30, %c0_31, %c0_32] : memref<3x3x32x8xf32, #tpu.memory_space<vmem>>, vector<1x1x32x8xf32>
    %31 = vector.shape_cast %30 : vector<1x1x32x8xf32> to vector<32x8xf32>
    %cst_33 = arith.constant dense<0.000000e+00> : vector<64x8xf32>
    %32 = tpu.matmul %29, %31, %cst_33 {dimension_numbers = #tpu.dot_dimension_numbers<[1], [0], [0], [1], [0, 0, 1, 1], [], []>} : vector<64x32xf32>, vector<32x8xf32>, vector<64x8xf32> -> vector<64x8xf32>
    %33 = arith.addf %27, %32 : vector<64x8xf32>
    %c0_34 = arith.constant 0 : index
    %c9 = arith.constant 9 : index
    %c0_35 = arith.constant 0 : index
    %34 = vector.load %arg8[%c0_34, %c9, %c0_35] : memref<10x24x32xf32, #tpu.memory_space<vmem>>, vector<8x8x32xf32>
    %35 = vector.shape_cast %34 : vector<8x8x32xf32> to vector<64x32xf32>
    %c0_36 = arith.constant 0 : index
    %c2 = arith.constant 2 : index
    %c0_37 = arith.constant 0 : index
    %c0_38 = arith.constant 0 : index
    %36 = vector.load %arg6[%c0_36, %c2, %c0_37, %c0_38] : memref<3x3x32x8xf32, #tpu.memory_space<vmem>>, vector<1x1x32x8xf32>
    %37 = vector.shape_cast %36 : vector<1x1x32x8xf32> to vector<32x8xf32>
    %cst_39 = arith.constant dense<0.000000e+00> : vector<64x8xf32>
    %38 = tpu.matmul %35, %37, %cst_39 {dimension_numbers = #tpu.dot_dimension_numbers<[1], [0], [0], [1], [0, 0, 1, 1], [], []>} : vector<64x32xf32>, vector<32x8xf32>, vector<64x8xf32> -> vector<64x8xf32>
    %39 = arith.addf %33, %38 : vector<64x8xf32>
    %c1_40 = arith.constant 1 : index
    %c7_41 = arith.constant 7 : index
    %c0_42 = arith.constant 0 : index
    %40 = vector.load %arg8[%c1_40, %c7_41, %c0_42] : memref<10x24x32xf32, #tpu.memory_space<vmem>>, vector<8x8x32xf32>
    %41 = vector.shape_cast %40 : vector<8x8x32xf32> to vector<64x32xf32>
    %c1_43 = arith.constant 1 : index
    %c0_44 = arith.constant 0 : index
    %c0_45 = arith.constant 0 : index
    %c0_46 = arith.constant 0 : index
    %42 = vector.load %arg6[%c1_43, %c0_44, %c0_45, %c0_46] : memref<3x3x32x8xf32, #tpu.memory_space<vmem>>, vector<1x1x32x8xf32>
    %43 = vector.shape_cast %42 : vector<1x1x32x8xf32> to vector<32x8xf32>
    %cst_47 = arith.constant dense<0.000000e+00> : vector<64x8xf32>
    %44 = tpu.matmul %41, %43, %cst_47 {dimension_numbers = #tpu.dot_dimension_numbers<[1], [0], [0], [1], [0, 0, 1, 1], [], []>} : vector<64x32xf32>, vector<32x8xf32>, vector<64x8xf32> -> vector<64x8xf32>
    %45 = arith.addf %39, %44 : vector<64x8xf32>
    %c1_48 = arith.constant 1 : index
    %c8_49 = arith.constant 8 : index
    %c0_50 = arith.constant 0 : index
    %46 = vector.load %arg8[%c1_48, %c8_49, %c0_50] : memref<10x24x32xf32, #tpu.memory_space<vmem>>, vector<8x8x32xf32>
    %47 = vector.shape_cast %46 : vector<8x8x32xf32> to vector<64x32xf32>
    %c1_51 = arith.constant 1 : index
    %c1_52 = arith.constant 1 : index
    %c0_53 = arith.constant 0 : index
    %c0_54 = arith.constant 0 : index
    %48 = vector.load %arg6[%c1_51, %c1_52, %c0_53, %c0_54] : memref<3x3x32x8xf32, #tpu.memory_space<vmem>>, vector<1x1x32x8xf32>
    %49 = vector.shape_cast %48 : vector<1x1x32x8xf32> to vector<32x8xf32>
    %cst_55 = arith.constant dense<0.000000e+00> : vector<64x8xf32>
    %50 = tpu.matmul %47, %49, %cst_55 {dimension_numbers = #tpu.dot_dimension_numbers<[1], [0], [0], [1], [0, 0, 1, 1], [], []>} : vector<64x32xf32>, vector<32x8xf32>, vector<64x8xf32> -> vector<64x8xf32>
    %51 = arith.addf %45, %50 : vector<64x8xf32>
    %c1_56 = arith.constant 1 : index
    %c9_57 = arith.constant 9 : index
    %c0_58 = arith.constant 0 : index
    %52 = vector.load %arg8[%c1_56, %c9_57, %c0_58] : memref<10x24x32xf32, #tpu.memory_space<vmem>>, vector<8x8x32xf32>
    %53 = vector.shape_cast %52 : vector<8x8x32xf32> to vector<64x32xf32>
    %c1_59 = arith.constant 1 : index
    %c2_60 = arith.constant 2 : index
    %c0_61 = arith.constant 0 : index
    %c0_62 = arith.constant 0 : index
    %54 = vector.load %arg6[%c1_59, %c2_60, %c0_61, %c0_62] : memref<3x3x32x8xf32, #tpu.memory_space<vmem>>, vector<1x1x32x8xf32>
    %55 = vector.shape_cast %54 : vector<1x1x32x8xf32> to vector<32x8xf32>
    %cst_63 = arith.constant dense<0.000000e+00> : vector<64x8xf32>
    %56 = tpu.matmul %53, %55, %cst_63 {dimension_numbers = #tpu.dot_dimension_numbers<[1], [0], [0], [1], [0, 0, 1, 1], [], []>} : vector<64x32xf32>, vector<32x8xf32>, vector<64x8xf32> -> vector<64x8xf32>
    %57 = arith.addf %51, %56 : vector<64x8xf32>
    %c2_64 = arith.constant 2 : index
    %c7_65 = arith.constant 7 : index
    %c0_66 = arith.constant 0 : index
    %58 = vector.load %arg8[%c2_64, %c7_65, %c0_66] : memref<10x24x32xf32, #tpu.memory_space<vmem>>, vector<8x8x32xf32>
    %59 = vector.shape_cast %58 : vector<8x8x32xf32> to vector<64x32xf32>
    %c2_67 = arith.constant 2 : index
    %c0_68 = arith.constant 0 : index
    %c0_69 = arith.constant 0 : index
    %c0_70 = arith.constant 0 : index
    %60 = vector.load %arg6[%c2_67, %c0_68, %c0_69, %c0_70] : memref<3x3x32x8xf32, #tpu.memory_space<vmem>>, vector<1x1x32x8xf32>
    %61 = vector.shape_cast %60 : vector<1x1x32x8xf32> to vector<32x8xf32>
    %cst_71 = arith.constant dense<0.000000e+00> : vector<64x8xf32>
    %62 = tpu.matmul %59, %61, %cst_71 {dimension_numbers = #tpu.dot_dimension_numbers<[1], [0], [0], [1], [0, 0, 1, 1], [], []>} : vector<64x32xf32>, vector<32x8xf32>, vector<64x8xf32> -> vector<64x8xf32>
    %63 = arith.addf %57, %62 : vector<64x8xf32>
    %c2_72 = arith.constant 2 : index
    %c8_73 = arith.constant 8 : index
    %c0_74 = arith.constant 0 : index
    %64 = vector.load %arg8[%c2_72, %c8_73, %c0_74] : memref<10x24x32xf32, #tpu.memory_space<vmem>>, vector<8x8x32xf32>
    %65 = vector.shape_cast %64 : vector<8x8x32xf32> to vector<64x32xf32>
    %c2_75 = arith.constant 2 : index
    %c1_76 = arith.constant 1 : index
    %c0_77 = arith.constant 0 : index
    %c0_78 = arith.constant 0 : index
    %66 = vector.load %arg6[%c2_75, %c1_76, %c0_77, %c0_78] : memref<3x3x32x8xf32, #tpu.memory_space<vmem>>, vector<1x1x32x8xf32>
    %67 = vector.shape_cast %66 : vector<1x1x32x8xf32> to vector<32x8xf32>
    %cst_79 = arith.constant dense<0.000000e+00> : vector<64x8xf32>
    %68 = tpu.matmul %65, %67, %cst_79 {dimension_numbers = #tpu.dot_dimension_numbers<[1], [0], [0], [1], [0, 0, 1, 1], [], []>} : vector<64x32xf32>, vector<32x8xf32>, vector<64x8xf32> -> vector<64x8xf32>
    %69 = arith.addf %63, %68 : vector<64x8xf32>
    %c2_80 = arith.constant 2 : index
    %c9_81 = arith.constant 9 : index
    %c0_82 = arith.constant 0 : index
    %70 = vector.load %arg8[%c2_80, %c9_81, %c0_82] : memref<10x24x32xf32, #tpu.memory_space<vmem>>, vector<8x8x32xf32>
    %71 = vector.shape_cast %70 : vector<8x8x32xf32> to vector<64x32xf32>
    %c2_83 = arith.constant 2 : index
    %c2_84 = arith.constant 2 : index
    %c0_85 = arith.constant 0 : index
    %c0_86 = arith.constant 0 : index
    %72 = vector.load %arg6[%c2_83, %c2_84, %c0_85, %c0_86] : memref<3x3x32x8xf32, #tpu.memory_space<vmem>>, vector<1x1x32x8xf32>
    %73 = vector.shape_cast %72 : vector<1x1x32x8xf32> to vector<32x8xf32>
    %cst_87 = arith.constant dense<0.000000e+00> : vector<64x8xf32>
    %74 = tpu.matmul %71, %73, %cst_87 {dimension_numbers = #tpu.dot_dimension_numbers<[1], [0], [0], [1], [0, 0, 1, 1], [], []>} : vector<64x32xf32>, vector<32x8xf32>, vector<64x8xf32> -> vector<64x8xf32>
    %75 = arith.addf %69, %74 : vector<64x8xf32>
    %76 = vector.shape_cast %75 : vector<64x8xf32> to vector<1x8x8x8xf32>
    %c0_88 = arith.constant 0 : index
    %c0_89 = arith.constant 0 : index
    %c0_90 = arith.constant 0 : index
    %c0_91 = arith.constant 0 : index
    %77 = vector.load %arg7[%c0_88, %c0_89, %c0_90, %c0_91] : memref<1x8x8x24xf32, #tpu.memory_space<vmem>>, vector<1x8x8x8xf32>
    tpu.vector_store %arg7[%c0_88, %c0_89, %c0_90, %c0_91], %76 {strides = array<i32>} : memref<1x8x8x24xf32, #tpu.memory_space<vmem>>, vector<1x8x8x8xf32>,
    %c0_92 = arith.constant 0 : index
    %c0_93 = arith.constant 0 : index
    %c0_94 = arith.constant 0 : index
    %c8_95 = arith.constant 8 : index
    %78 = vector.load %arg7[%c0_92, %c0_93, %c0_94, %c8_95] : memref<1x8x8x24xf32, #tpu.memory_space<vmem>>, vector<1x8x8x16xf32>
    tpu.vector_store %arg7[%c0_92, %c0_93, %c0_94, %c8_95], %0 {strides = array<i32>} : memref<1x8x8x24xf32, #tpu.memory_space<vmem>>, vector<1x8x8x16xf32>,
    return
  }
  func.func @transform_0(%arg0: i32) -> (i32, i32, i32, i32) {
    %c0_i32 = arith.constant 0 : i32
    %c0_i32_0 = arith.constant 0 : i32
    %c0_i32_1 = arith.constant 0 : i32
    %c0_i32_2 = arith.constant 0 : i32
    return %arg0, %c0_i32, %c0_i32_0, %c0_i32_1 : i32, i32, i32, i32
  }
  func.func @transform_1(%arg0: i32) -> (i32, i32) {
    %c0_i32 = arith.constant 0 : i32
    %c0_i32_0 = arith.constant 0 : i32
    %c0_i32_1 = arith.constant 0 : i32
    return %c0_i32, %c0_i32_0 : i32, i32
  }
  func.func @transform_2(%arg0: i32) -> (i32, i32) {
    %c0_i32 = arith.constant 0 : i32
    %c0_i32_0 = arith.constant 0 : i32
    %c0_i32_1 = arith.constant 0 : i32
    return %c0_i32, %c0_i32_0 : i32, i32
  }
  func.func @transform_3(%arg0: i32) -> (i32, i32) {
    %c0_i32 = arith.constant 0 : i32
    %c0_i32_0 = arith.constant 0 : i32
    %c0_i32_1 = arith.constant 0 : i32
    return %c0_i32, %c0_i32_0 : i32, i32
  }
  func.func @transform_4(%arg0: i32) -> (i32, i32) {
    %c0_i32 = arith.constant 0 : i32
    %c0_i32_0 = arith.constant 0 : i32
    %c0_i32_1 = arith.constant 0 : i32
    return %c0_i32, %c0_i32_0 : i32, i32
  }
  func.func @transform_5(%arg0: i32) -> (i32, i32, i32, i32) {
    %c0_i32 = arith.constant 0 : i32
    %c0_i32_0 = arith.constant 0 : i32
    %c0_i32_1 = arith.constant 0 : i32
    %c0_i32_2 = arith.constant 0 : i32
    %c0_i32_3 = arith.constant 0 : i32
    return %c0_i32, %c0_i32_0, %c0_i32_1, %c0_i32_2 : i32, i32, i32, i32
  }
  func.func @transform_6(%arg0: i32) -> (i32, i32, i32, i32) {
    %c0_i32 = arith.constant 0 : i32
    %c0_i32_0 = arith.constant 0 : i32
    %c0_i32_1 = arith.constant 0 : i32
    %c0_i32_2 = arith.constant 0 : i32
    return %arg0, %c0_i32, %c0_i32_0, %c0_i32_1 : i32, i32, i32, i32
  }
}

</mosaic_0001>

<bundles_post_ra>
// kernel: bottleneck_forward.1
= control target key start
LH: loop header
LB: loop body
LE: loop exit
PB: predicated region body
PF: predicated region fallthrough
CT: control target
= control target key end

     0   :  { %11 = vsyncpa [#allocation4], 0  ;;  %s3182_s0 = inlined_call_operand.vmem [shape: f32[2,8,8,16], index: 0, kind: input, shape index: {}]   ;;  %s3183_s1 = inlined_call_operand.vmem [shape: f32[1,16], index: 1, kind: input, shape index: {}]   ;;  %s3184_s2 = inlined_call_operand.vmem [shape: f32[1,16], index: 2, kind: input, shape index: {}]   ;;  %s3185_s3 = inlined_call_operand.vmem [shape: f32[16,32], index: 3, kind: input, shape index: {}]   ;;  %s3186_s4 = inlined_call_operand.vmem [shape: f32[1,32], index: 4, kind: input, shape index: {}]   ;;  %s3187_s5 = inlined_call_operand.vmem [shape: f32[3,3,32,8], index: 5, kind: input, shape index: {}]   ;;  %s3188_s6 = inlined_call_operand.hbm [shape: f32[2,8,8,24], index: 6, kind: output, shape index: {}]  }
   0x1   :  { %13 = vsyncpa [#allocation4 + $0x1], 0  ;;  %s2671_s21 = smov 0   ;;  %s2673_s22 = smov 0  }
   0x2   :  { %s2675_s23 = smov 0   ;;  %s2677_s24 = smov 0  }
   0x3 LB: > { %s2692_s25 = sadd.s32 4294967295, %s2630_s24   ;;  %s1943_s26 = sadd.s32 4294967294, %s2630_s24   ;;  %s2630_s24 = sphi %s2677_s24, %s3194_s24   ;;  %s2626_s23 = sphi %s2675_s23, %s3193_s23   ;;  %s2622_s22 = sphi %s2673_s22, %s3192_s22   ;;  %s2618_s21 = sphi %s2671_s21, %s3191_s21  }
   0x4   : > { %s2696_s27 = sadd.s32 1, %s2630_s24   ;;  %s157_s28 = sadd.s32 1, %s2626_s23 }
   0x5   : > { %s154_s29 = ssub.s32 %s2630_s24, %s2696_s27  ;;  %p167_p0 = scmp.ne.s32.totalorder %s2626_s23, %s2622_s22 }
   0x6   : > { %p155_p1 = scmp.eq.s32.totalorder %s154_s29, 0  ;;  %p168_p2 = scmp.eq.s32.totalorder %s2692_s25, 1 }
   0x7   : > { %p173_p3 = scmp.ne.s32.totalorder %s2622_s22, %s2618_s21  ;;  %p174_p4 = scmp.eq.s32.totalorder %s1943_s26, 1 }
   0x8   : > { %s2707_s30 = scalar_select %p155_p1, %s2626_s23, %s157_s28  }
   0x9   : > { %p2709_p5 = por %p168_p2, %p167_p0  ;;  %p2713_p6 = por %p174_p4, %p173_p3 }
   0xa   : > { %p1946_p7 = scmp.ge.s32.totalorder %s2630_s24, 1  ;;  %p215_p8 = scmp.lt.s32.totalorder %s2630_s24, 3 }
   0xc   : > { %p216_p9 = pnand %p1946_p7, %p215_p8 }
   0xd   : > { %v296_v0 = vld [vmem:[%s3185_s3] sm:$0xff] (!%p216_p9)  ;;  %v297_v1 = vld [vmem:[%s3185_s3 + $0x8] sm:$0xff] (!%p216_p9)  ;;  %p245_p10 = scmp.lt.s32.totalorder (!%p216_p9), %s2692_s25, 1  ;;  %vm305_vm0 = vcmask (!%p216_p9), 130048   ;;  %vm443_vm1 = vcmask (!%p216_p9), 261120   ;;  %v2632_v39 = vmov (!%p216_p9), 0.0  }
   0xe   : > { %219 = sbr.rel (%p216_p9) target bundleno = 566 (0x236), region = 44  ;;  %v2386_v2 = vpack.c.bf16 (!%p216_p9), %v297_v1, %v296_v0  ;;  %v1950_v3 = vld [vmem:[%s3183_s1] ss:$0 sm:$0xff] (!%p216_p9)  ;;  %v1962_v38 = vld [vmem:[%s3187_s5 + $0x28] sm:$0xff] (!%p216_p9)  ;;  %451 = vst.msk [vmem:[#allocation2 + $0x38] sm:$0xff] (!%p216_p9), %vm443_vm1, %v2632_v39  ;;  %444 = vst.msk [vmem:[#allocation2] sm:$0xff] (!%p216_p9), %vm443_vm1, %v2632_v39 }
   0xf   : > { %v1951_v4 = vld [vmem:[%s3184_s2] ss:$0 sm:$0xff] (!%p216_p9)  ;;  %445 = vst.msk [vmem:[#allocation2 + $0x8] sm:$0xff] (!%p216_p9), %vm443_vm1, %v2632_v39  ;;  %446 = vst.msk [vmem:[#allocation2 + $0x10] sm:$0xff] (!%p216_p9), %vm443_vm1, %v2632_v39  ;;  %v2006_v42 = vld [vmem:[%s3187_s5 + $0x88] sm:$0xff] (!%p216_p9)  ;;  %s2633_s16 = smov (!%p216_p9), 8  }
  0x10   : > { %2387 = vmatprep.subr.bf16.mxu0 (!%p216_p9), %v2386_v2  ;;  %v1961_v37 = vld [vmem:[%s3187_s5 + $0x20] sm:$0xff] (!%p216_p9)  ;;  %447 = vst.msk [vmem:[#allocation2 + $0x18] sm:$0xff] (!%p216_p9), %vm443_vm1, %v2632_v39  ;;  %448 = vst.msk [vmem:[#allocation2 + $0x20] sm:$0xff] (!%p216_p9), %vm443_vm1, %v2632_v39  ;;  %v1963_v44 = vld [vmem:[%s3187_s5 + $0x30] sm:$0xff] (!%p216_p9)  ;;  %s242_s10 = sand.u32 (!%p216_p9), 1, %s2622_s22   ;;  %vm1817_vm2 = vcmask (!%p216_p9), 64512  }
  0x11   : > { %2389 = vmatpush3.bf16.msra.mxu0 (!%p216_p9), %v2386_v2  ;;  %449 = vst.msk [vmem:[#allocation2 + $0x28] sm:$0xff] (!%p216_p9), %vm443_vm1, %v2632_v39  ;;  %450 = vst.msk [vmem:[#allocation2 + $0x30] sm:$0xff] (!%p216_p9), %vm443_vm1, %v2632_v39  ;;  %v2390_v40 = vpack.c.bf16 (!%p216_p9), %v1962_v38, %v1961_v37  ;;  %v2005_v41 = vld [vmem:[%s3187_s5 + $0x80] sm:$0xff] (!%p216_p9)  ;;  %v1964_v45 = vld [vmem:[%s3187_s5 + $0x38] sm:$0xff] (!%p216_p9)  ;;  %s1947_s11 = sshll.u32 (!%p216_p9), %s242_s10, 6  ;;  %vm1858_vm3 = vcmask (!%p216_p9), 195648  }
  0x12   : > { %452 = vst.msk [vmem:[#allocation2 + $0x40] sm:$0xff] (!%p216_p9), %vm443_vm1, %v2632_v39  ;;  %453 = vst.msk [vmem:[#allocation2 + $0x48] sm:$0xff] (!%p216_p9), %vm443_vm1, %v2632_v39  ;;  %v2422_v43 = vpack.c.bf16 (!%p216_p9), %v2006_v42, %v2005_v41  ;;  %v2394_v46 = vpack.c.bf16 (!%p216_p9), %v1964_v45, %v1963_v44  ;;  %v2007_v47 = vld [vmem:[%s3187_s5 + $0x90] sm:$0xff] (!%p216_p9)  ;;  %v2008_v48 = vld [vmem:[%s3187_s5 + $0x98] sm:$0xff] (!%p216_p9)  ;;  %s3095_s12 = scalar_lea.vmem (!%p216_p9), [#allocation3], %s1947_s11  ;;  %s3140_s18 = scalar_lea.sflag (!%p216_p9), [#allocation4], %s242_s10 }
  0x13   : > { %454 = vst.msk [vmem:[#allocation2 + $0x50] sm:$0xff] (!%p216_p9), %vm443_vm1, %v2632_v39  ;;  %455 = vst.msk [vmem:[#allocation2 + $0x58] sm:$0xff] (!%p216_p9), %vm443_vm1, %v2632_v39  ;;  %2391 = vmatprep.subr.bf16.mxu0 (!%p216_p9), %v2390_v40  ;;  %v2426_v49 = vpack.c.bf16 (!%p216_p9), %v2008_v48, %v2007_v47  ;;  %v2017_v51 = vld [vmem:[%s3187_s5 + $0xa0] sm:$0xff] (!%p216_p9)  ;;  %v2018_v52 = vld [vmem:[%s3187_s5 + $0xa8] sm:$0xff] (!%p216_p9)  ;;  %s2634_s20 = smov (!%p216_p9), [#allocation3]  }
  0x14   : > { %456 = vst.msk [vmem:[#allocation2 + $0x60] sm:$0xff] (!%p216_p9), %vm443_vm1, %v2632_v39  ;;  %457 = vst.msk [vmem:[#allocation2 + $0x68] sm:$0xff] (!%p216_p9), %vm443_vm1, %v2632_v39  ;;  %2423 = vmatprep.subr.bf16.mxu1 (!%p216_p9), %v2422_v43  ;;  %v2430_v53 = vpack.c.bf16 (!%p216_p9), %v2018_v52, %v2017_v51  ;;  %v491_v54 = vld [vmem:[%s3187_s5] sm:$0xff] (!%p216_p9)  ;;  %v492_v55 = vld [vmem:[%s3187_s5 + $0x8] sm:$0xff] (!%p216_p9)  ;;  %s2572_s26 = sshll.u32 (!%p216_p9), %s2634_s20, 4  ;;  %s2573_s26 = int_to_ptr.vmem [resolvable:$false] %s2572_s26 }
  0x15   : > { %s246_s13 = scalar_select %p245_p10, %s2692_s25, 1  ;;  %458 = vst.msk [vmem:[#allocation2 + $0x70] sm:$0xff] %vm443_vm1, %v2632_v39  ;;  %459 = vst.msk [vmem:[#allocation2 + $0x78] sm:$0xff] %vm443_vm1, %v2632_v39  ;;  %2425 = vmatpush3.bf16.msra.mxu1 %v2422_v43  ;;  %v2398_v56 = vpack.c.bf16 %v492_v55, %v491_v54  ;;  %v1952_v57 = vld [vmem:[%s3186_s4] ss:$0 sm:$0xff]  ;;  %v1983_v42 = vld [vmem:[%s3187_s5 + $0x50] sm:$0xff] }
  0x16   : > { %460 = vst.msk [vmem:[#allocation2 + $0x80] sm:$0xff] %vm443_vm1, %v2632_v39  ;;  %461 = vst.msk [vmem:[#allocation2 + $0x88] sm:$0xff] %vm443_vm1, %v2632_v39  ;;  %2427 = vmatprep.subr.bf16.mxu1 %v2426_v49  ;;  %v495_v50 = vld [vmem:[#allocation2 + $0x8] sm:$0xff]  ;;  %v1984_v43 = vld [vmem:[%s3187_s5 + $0x58] sm:$0xff]  ;;  %s2574_s28 = scalar_lea.vmem %s2573_s26, 2048 }
  0x17   : > { %s2070_s14 = sshll.u32 %s246_s13, 6  ;;  %462 = vst.msk [vmem:[#allocation2 + $0x90] sm:$0xff] %vm443_vm1, %v2632_v39  ;;  %463 = vst.msk [vmem:[#allocation2 + $0x98] sm:$0xff] %vm443_vm1, %v2632_v39  ;;  %v1993_v52 = vld [vmem:[%s3187_s5 + $0x60] sm:$0xff]  ;;  %s2071_s13 = sshll.u32 %s2692_s25, 10 }
  0x18   : > { %s249_s19 = scalar_lea.vmem %s3182_s0, %s2070_s14  ;;  %464 = vst.msk [vmem:[#allocation2 + $0xa0] sm:$0xff] %vm443_vm1, %v2632_v39  ;;  %465 = vst.msk [vmem:[#allocation2 + $0xa8] sm:$0xff] %vm443_vm1, %v2632_v39  ;;  %s1881_s14 = sshll.u32 %s3095_s12, 4  ;;  %s3130_s14 = int_to_ptr.vmem [resolvable:$true] %s1881_s14 }
  0x19   : > { %v2736_v5 = vld [vmem:[%s249_s19] sm:$0xff]  ;;  %v2738_v6 = vld [vmem:[%s249_s19 + $0x8] sm:$0xff]  ;;  %v2740_v7 = vld [vmem:[%s249_s19 + $0x10] sm:$0xff]  ;;  %466 = vst.msk [vmem:[#allocation2 + $0xb0] sm:$0xff] %vm443_vm1, %v2632_v39  ;;  %2429 = vmatpush3.bf16.msra.mxu1 %v2426_v49  ;;  %v2410_v49 = vpack.c.bf16 %v1984_v43, %v1983_v42  ;;  %s3126_s25 = scalar_lea.hbm %s3188_s6, %s2071_s13  ;;  %p2575_p0 = scmp.lt.s32.totalorder %s3130_s14, %s2573_s26 }
  0x1a   : > { %v265_v8 = vmul.f32 %v1950_v3, %v2736_v5  ;;  %v266_v9 = vmul.f32 %v1950_v3, %v2738_v6  ;;  %v267_v10 = vmul.f32 %v1950_v3, %v2740_v7  ;;  %v2745_v11 = vld [vmem:[%s249_s19 + $0x18] sm:$0xff]  ;;  %v2747_v12 = vld [vmem:[%s249_s19 + $0x20] sm:$0xff]  ;;  %v2749_v13 = vld [vmem:[%s249_s19 + $0x28] sm:$0xff]  ;;  %467 = vst.msk [vmem:[#allocation2 + $0xb8] sm:$0xff] %vm443_vm1, %v2632_v39  ;;  %2431 = vmatprep.subr.bf16.mxu1 %v2430_v53 }
  0x1b   : > { %v268_v14 = vmul.f32 %v1950_v3, %v2745_v11  ;;  %v269_v15 = vmul.f32 %v1950_v3, %v2747_v12  ;;  %v2753_v16 = vld [vmem:[%s249_s19 + $0x30] sm:$0xff]  ;;  %v270_v21 = vmul.f32 %v1950_v3, %v2749_v13  ;;  %v2757_v27 = vld [vmem:[%s249_s19 + $0x38] sm:$0xff]  ;;  %468 = vst.msk [vmem:[#allocation2 + $0xc0] sm:$0xff] %vm443_vm1, %v2632_v39  ;;  %469 = vst.msk [vmem:[#allocation2 + $0xc8] sm:$0xff] %vm443_vm1, %v2632_v39  ;;  %1838 = vrot.lane.b32.xlu1 %v2740_v7, %s2633_s16  ;;  %s2568_s19 = scalar_lea.vmem %s3130_s14, 1024 }
  0x1c   : > { %v280_v17 = vadd.f32 %v1951_v4, %v265_v8  ;;  %v281_v18 = vadd.f32 %v1951_v4, %v266_v9  ;;  %v282_v19 = vadd.f32 %v1951_v4, %v267_v10  ;;  %v271_v22 = vmul.f32 %v1950_v3, %v2753_v16  ;;  %470 = vst.msk [vmem:[#allocation2 + $0xd0] sm:$0xff] %vm443_vm1, %v2632_v39  ;;  %v2019_v9 = vld [vmem:[%s3187_s5 + $0xb0] sm:$0xff]  ;;  %p2569_p11 = scmp.ne.s32.totalorder %s3130_s14, %s2568_s19  ;;  %p2576_p1 = scmp.lt.s32.totalorder %s2574_s28, %s2568_s19 }
  0x1d   : > { %v283_v20 = vadd.f32 %v1951_v4, %v268_v14  ;;  %v284_v26 = vadd.f32 %v1951_v4, %v269_v15  ;;  %v285_v29 = vadd.f32 %v1951_v4, %v270_v21  ;;  %v272_v30 = vmul.f32 %v1950_v3, %v2757_v27  ;;  %471 = vst.msk [vmem:[#allocation2 + $0xd8] sm:$0xff] %vm443_vm1, %v2632_v39 }
  0x1e   : > { %v288_v23 = vmax.f32 %v280_v17, 0.0  ;;  %v289_v24 = vmax.f32 %v281_v18, 0.0  ;;  %v290_v25 = vmax.f32 %v282_v19, 0.0  ;;  %v286_v32 = vadd.f32 %v1951_v4, %v271_v22  ;;  %472 = vst.msk [vmem:[#allocation2 + $0xe0] sm:$0xff] %vm443_vm1, %v2632_v39  ;;  %473 = vst.msk [vmem:[#allocation2 + $0xe8] sm:$0xff] %vm443_vm1, %v2632_v39  ;;  %1834 = vrot.lane.b32.xlu0 %v2736_v5, %s2633_s16  ;;  %v2029_v22 = vld [vmem:[%s3187_s5 + $0xc0] sm:$0xff]  ;;  %p2570_p12 = pnand %p2569_p11, %p2709_p5  ;;  %p2577_p2 = por %p2576_p1, %p2575_p0 }
  0x1f   : > { %v291_v28 = vmax.f32 %v283_v20, 0.0  ;;  %v292_v31 = vmax.f32 %v284_v26, 0.0  ;;  %v293_v33 = vmax.f32 %v285_v29, 0.0  ;;  %v287_v34 = vadd.f32 %v1951_v4, %v272_v30  ;;  %1840 = vrot.lane.b32.xlu1 %v2745_v11, %s2633_s16  ;;  %v2020_v11 = vld [vmem:[%s3187_s5 + $0xb8] sm:$0xff]  ;;  %v1981_v26 = vld [vmem:[%s3187_s5 + $0x40] sm:$0xff]  ;;  %v2031_v39 = vld [vmem:[%s3187_s5 + $0xd0] sm:$0xff] }
  0x20   : > { %2194 = vmatprep.mubr.msk.f32.mxu0 %vm305_vm0, %v288_v23  ;;  %v294_v35 = vmax.f32 %v286_v32, 0.0  ;;  %v2434_v20 = vpack.c.bf16 %v2020_v11, %v2019_v9  ;;  %v2030_v23 = vld [vmem:[%s3187_s5 + $0xc8] sm:$0xff]  ;;  %v2053_v9 = vld [vmem:[%s3187_s5 + $0x100] sm:$0xff]  ;;  %p2571_p13 = pneg %p2570_p12 }
  0x21   : > { %2195 = vmatmul.mubr.msk.f32.vlgmr.msra.gmra.mrb[0].mxu0 %vm305_vm0, %v289_v24  ;;  %v295_v36 = vmax.f32 %v287_v34, 0.0 }
  0x22   : > { %2197 = vmatprep.mubr.msk.f32.mxu0 %vm305_vm0, %v290_v25  ;;  %2393 = vmatpush3.bf16.msra.mxu0 %v2390_v40  ;;  %v2032_v40 = vld [vmem:[%s3187_s5 + $0xd8] sm:$0xff]  ;;  %p2578_p3 = pnand %p2577_p2, %p2571_p13 }
  0x23   : > { %2395 = vmatprep.subr.bf16.mxu0 %v2394_v46  ;;  %1836 = vrot.lane.b32.xlu0 %v2738_v6, %s2633_s16  ;;  %v2442_v45 = vpack.c.bf16 %v2032_v40, %v2031_v39 }
  0x24   : > { %1844 = vrot.lane.b32.xlu1 %v2749_v13, %s2633_s16  ;;  %v494_v13 = vld [vmem:[%s3187_s5 + $0x18] sm:$0xff] }
  0x25   : > { %2198 = vmatmul.mubr.msk.f32.gmra.mrb[2].mxu0 %vm305_vm0, %v291_v28 }
  0x26   : > { %2200 = vmatprep.mubr.msk.f32.mxu0 %vm305_vm0, %v292_v31  ;;  %2397 = vmatpush3.bf16.msra.mxu0 %v2394_v46  ;;  %v2438_v31 = vpack.c.bf16 %v2030_v23, %v2029_v22  ;;  %v2041_v46 = vld [vmem:[%s3187_s5 + $0xe0] sm:$0xff] }
  0x27   : > { %2399 = vmatprep.subr.bf16.mxu0 %v2398_v56  ;;  %1842 = vrot.lane.b32.xlu0 %v2747_v12, %s2633_s16  ;;  %v493_v12 = vld [vmem:[%s3187_s5 + $0x10] sm:$0xff] }
  0x28   : > { %1848 = vrot.lane.b32.xlu1 %v2757_v27, %s2633_s16  ;;  %v2402_v21 = vpack.c.bf16 %v494_v13, %v493_v12  ;;  %v1982_v27 = vld [vmem:[%s3187_s5 + $0x48] sm:$0xff]  ;;  %v1374_v13 = vld [vmem:[#allocation2 + $0xdf] sm:$0xff] }
  0x29   : > { %2201 = vmatmul.mubr.msk.f32.gmra.mrb[4].mxu0 %vm305_vm0, %v293_v33  ;;  %v2406_v32 = vpack.c.bf16 %v1982_v27, %v1981_v26 }
  0x2a   : > { %2203 = vmatprep.mubr.msk.f32.mxu0 %vm305_vm0, %v294_v35 }
  0x2b   : > { %1846 = vrot.lane.b32.xlu0 %v2753_v16, %s2633_s16 }
  0x2d   : > { %2204 = vmatmul.mubr.msk.f32.gmra.mrb[6].mxu0 %vm305_vm0, %v295_v36  ;;  %v483_v36 = vld [vmem:[#allocation2 + $0x7] sm:$0xff] }
  0x2e   : > { %2214 = vmatprep.mubr.msk.f32.mxu0 %vm443_vm1, %v495_v50  ;;  %v2042_v50 = vld [vmem:[%s3187_s5 + $0xe8] sm:$0xff] }
  0x2f   : > { %v2446_v55 = vpack.c.bf16 %v2042_v50, %v2041_v46 }
  0x90   : > { %v1835_v27 = vpop.permute.xlu0 %1834 }
  0xf4   : > { %v2196_v58 = vpop.f32.mrb[0].mxu0 }
  0xf5   : > { %v402_v59 = vadd.f32 %v2196_v58, %v1952_v57  ;;  %v396_v60 = vpop.f32.mrb[1].mxu0 }
  0xf6   : > { %v397_v61 = vadd.f32 %v1952_v57, %v396_v60 }
  0xf7   : > { %v436_v62 = vmax.f32 %v402_v59, 0.0 }
  0xf8   : > { %v435_v63 = vmax.f32 %v397_v61, 0.0  ;;  %v2199_v0 = vpop.f32.mrb[2].mxu0 }
  0xf9   : > { %476 = vst.msk [vmem:[#allocation2 + $0x38] sm:$0xff] %vm443_vm1, %v436_v62  ;;  %v412_v1 = vadd.f32 %v2199_v0, %v1952_v57  ;;  %v406_v2 = vpop.f32.mrb[3].mxu0  ;;  %v766_v0 = vld [vmem:[#allocation2 + $0x9] sm:$0xff] }
  0xfa   : > { %475 = vst.msk [vmem:[#allocation2 + $0x20] sm:$0xff] %vm443_vm1, %v435_v63  ;;  %v407_v3 = vadd.f32 %v1952_v57, %v406_v2 }
  0xfb   : > { %v438_v4 = vmax.f32 %v412_v1, 0.0 }
  0xfc   : > { %v437_v5 = vmax.f32 %v407_v3, 0.0  ;;  %v2202_v6 = vpop.f32.mrb[4].mxu0  ;;  %v2043_v3 = vld [vmem:[%s3187_s5 + $0xf0] sm:$0xff] }
  0xfd   : > { %478 = vst.msk [vmem:[#allocation2 + $0x68] sm:$0xff] %vm443_vm1, %v438_v4  ;;  %v422_v7 = vadd.f32 %v2202_v6, %v1952_v57  ;;  %v416_v8 = vpop.f32.mrb[5].mxu0  ;;  %v2044_v4 = vld [vmem:[%s3187_s5 + $0xf8] sm:$0xff] }
  0xfe   : > { %477 = vst.msk [vmem:[#allocation2 + $0x50] sm:$0xff] %vm443_vm1, %v437_v5  ;;  %v417_v10 = vadd.f32 %v1952_v57, %v416_v8  ;;  %v1995_v5 = vld [vmem:[%s3187_s5 + $0x70] sm:$0xff]  ;;  %v1996_v6 = vld [vmem:[%s3187_s5 + $0x78] sm:$0xff] }
  0xff   : > { %v440_v14 = vmax.f32 %v422_v7, 0.0  ;;  %v2450_v7 = vpack.c.bf16 %v2044_v4, %v2043_v3  ;;  %v2418_v8 = vpack.c.bf16 %v1996_v6, %v1995_v5 }
 0x100   : > { %v439_v15 = vmax.f32 %v417_v10, 0.0  ;;  %v2205_v16 = vpop.f32.mrb[6].mxu0  ;;  %v2880_v25 = vld [vmem:[#allocation2 + $0x38] sm:$0xff]  ;;  %v2054_v10 = vld [vmem:[%s3187_s5 + $0x108] sm:$0xff] }
 0x101   : > { %480 = vst.msk [vmem:[#allocation2 + $0x98] sm:$0xff] %vm443_vm1, %v440_v14  ;;  %v432_v17 = vadd.f32 %v2205_v16, %v1952_v57  ;;  %v426_v18 = vpop.f32.mrb[7].mxu0  ;;  %v496_v19 = vld [vmem:[#allocation2 + $0x20] sm:$0xff]  ;;  %v2949_v47 = vld [vmem:[#allocation2 + $0x37] sm:$0xff]  ;;  %v2454_v11 = vpack.c.bf16 %v2054_v10, %v2053_v9 }
 0x102   : > { %479 = vst.msk [vmem:[#allocation2 + $0x80] sm:$0xff] %vm443_vm1, %v439_v15  ;;  %v427_v24 = vadd.f32 %v1952_v57, %v426_v18  ;;  %2215 = vmatmul.mubr.msk.f32.vlgmr.msra.gmra.mrb[8].mxu0 %vm443_vm1, %v496_v19  ;;  %2294 = vmatprep.mubr.msk.f32.mxu1 %vm443_vm1, %v496_v19  ;;  %v1216_v41 = vld [vmem:[#allocation2 + $0x21] sm:$0xff]  ;;  %v2951_v48 = vld [vmem:[#allocation2 + $0x39] sm:$0xff]  ;;  %v2055_v14 = vld [vmem:[%s3187_s5 + $0x110] sm:$0xff] }
 0x103   : > { %v442_v28 = vmax.f32 %v432_v17, 0.0  ;;  %2217 = vmatprep.mubr.msk.f32.mxu0 %vm443_vm1, %v2880_v25  ;;  %2295 = vmatmul.mubr.msk.f32.vlgmr.msra.gmra.mrb[0].mxu1 %vm443_vm1, %v2880_v25  ;;  %v2942_v44 = vld [vmem:[#allocation2 + $0x1f] sm:$0xff] }
 0x104   : > { %v441_v29 = vmax.f32 %v427_v24, 0.0  ;;  %2433 = vmatpush3.bf16.msra.mxu1 %v2430_v53  ;;  %2401 = vmatpush3.bf16.msra.mxu0 %v2398_v56  ;;  %v2900_v33 = vld [vmem:[#allocation2 + $0x68] sm:$0xff]  ;;  %v2056_v15 = vld [vmem:[%s3187_s5 + $0x118] sm:$0xff]  ;;  %v1524_v17 = vld [vmem:[#allocation2 + $0xe0] sm:$0xff] }
 0x105   : > { %482 = vst.msk [vmem:[#allocation2 + $0xc8] sm:$0xff] %vm443_vm1, %v442_v28  ;;  %v2893_v30 = vld [vmem:[#allocation2 + $0x50] sm:$0xff]  ;;  %2435 = vmatprep.subr.bf16.mxu1 %v2434_v20  ;;  %2403 = vmatprep.subr.bf16.mxu0 %v2402_v21  ;;  %v1994_v53 = vld [vmem:[%s3187_s5 + $0x68] sm:$0xff]  ;;  %v2458_v16 = vpack.c.bf16 %v2056_v15, %v2055_v14 }
 0x106   : > { %481 = vst.msk [vmem:[#allocation2 + $0xb0] sm:$0xff] %vm443_vm1, %v441_v29  ;;  %2218 = vmatmul.mubr.msk.f32.gmra.mrb[10].mxu0 %vm443_vm1, %v2893_v30  ;;  %2297 = vmatprep.mubr.msk.f32.mxu1 %vm443_vm1, %v2893_v30  ;;  %v2960_v51 = vld [vmem:[#allocation2 + $0x51] sm:$0xff]  ;;  %v2974_v56 = vld [vmem:[#allocation2 + $0x67] sm:$0xff]  ;;  %v2414_v58 = vpack.c.bf16 %v1994_v53, %v1993_v52 }
 0x107   : > { %2220 = vmatprep.mubr.msk.f32.mxu0 %vm443_vm1, %v2900_v33  ;;  %2298 = vmatmul.mubr.msk.f32.gmra.mrb[2].mxu1 %vm443_vm1, %v2900_v33  ;;  %v2970_v54 = vld [vmem:[#allocation2 + $0x4f] sm:$0xff]  ;;  %v1674_v18 = vld [vmem:[#allocation2 + $0xe1] sm:$0xff] }
 0x108   : > { %2437 = vmatpush3.bf16.msra.mxu1 %v2434_v20  ;;  %2405 = vmatpush3.bf16.msra.mxu0 %v2402_v21  ;;  %v2912_v35 = vld [vmem:[#allocation2 + $0x98] sm:$0xff]  ;;  %v2976_v57 = vld [vmem:[#allocation2 + $0x69] sm:$0xff] }
 0x109   : > { %v2906_v34 = vld [vmem:[#allocation2 + $0x80] sm:$0xff]  ;;  %2439 = vmatprep.subr.bf16.mxu1 %v2438_v31  ;;  %2407 = vmatprep.subr.bf16.mxu0 %v2406_v32  ;;  %v489_v61 = vld [vmem:[#allocation2 + $0x97] sm:$0xff] }
 0x10a   : > { %2221 = vmatmul.mubr.msk.f32.gmra.mrb[12].mxu0 %vm443_vm1, %v2906_v34  ;;  %2300 = vmatprep.mubr.msk.f32.mxu1 %vm443_vm1, %v2906_v34  ;;  %v2982_v59 = vld [vmem:[#allocation2 + $0x81] sm:$0xff]  ;;  %v2987_v62 = vld [vmem:[#allocation2 + $0x99] sm:$0xff] }
 0x10b   : > { %2223 = vmatprep.mubr.msk.f32.mxu0 %vm443_vm1, %v2912_v35  ;;  %2301 = vmatmul.mubr.msk.f32.gmra.mrb[4].mxu1 %vm443_vm1, %v2912_v35  ;;  %v488_v60 = vld [vmem:[#allocation2 + $0x7f] sm:$0xff] }
 0x10c   : > { %v2924_v38 = vld [vmem:[#allocation2 + $0xc8] sm:$0xff] }
 0x10d   : > { %v2918_v37 = vld [vmem:[#allocation2 + $0xb0] sm:$0xff]  ;;  %v1373_v12 = vld [vmem:[#allocation2 + $0xc7] sm:$0xff] }
 0x10e   : > { %2224 = vmatmul.mubr.msk.f32.gmra.mrb[14].mxu0 %vm443_vm1, %v2918_v37  ;;  %2303 = vmatprep.mubr.msk.f32.mxu1 %vm443_vm1, %v2918_v37  ;;  %v2992_v63 = vld [vmem:[#allocation2 + $0xb1] sm:$0xff]  ;;  %v2997_v2 = vld [vmem:[#allocation2 + $0xc9] sm:$0xff] }
 0x10f   : > { %2304 = vmatmul.mubr.msk.f32.gmra.mrb[6].mxu1 %vm443_vm1, %v2924_v38  ;;  %2234 = vmatprep.mubr.msk.f32.mxu0 %vm443_vm1, %v483_v36  ;;  %v490_v1 = vld [vmem:[#allocation2 + $0xaf] sm:$0xff] }
 0x110   : > { %2314 = vmatprep.mubr.msk.f32.mxu1 %vm443_vm1, %v1216_v41 }
 0x112   : > { %2235 = vmatmul.mubr.msk.f32.vlgmr.msra.gmra.mrb[8].mxu0 %vm443_vm1, %v2942_v44 }
 0x113   : > { %2237 = vmatprep.mubr.msk.f32.mxu0 %vm443_vm1, %v2949_v47  ;;  %2315 = vmatmul.mubr.msk.f32.vlgmr.msra.gmra.mrb[0].mxu1 %vm443_vm1, %v2951_v48 }
 0x114   : > { %2441 = vmatpush3.bf16.msra.mxu1 %v2438_v31  ;;  %2317 = vmatprep.mubr.msk.f32.mxu1 %vm443_vm1, %v2960_v51 }
 0x115   : > { %2443 = vmatprep.subr.bf16.mxu1 %v2442_v45  ;;  %2409 = vmatpush3.bf16.msra.mxu0 %v2406_v32 }
 0x116   : > { %2238 = vmatmul.mubr.msk.f32.gmra.mrb[10].mxu0 %vm443_vm1, %v2970_v54  ;;  %2411 = vmatprep.subr.bf16.mxu0 %v2410_v49 }
 0x117   : > { %2240 = vmatprep.mubr.msk.f32.mxu0 %vm443_vm1, %v2974_v56  ;;  %2318 = vmatmul.mubr.msk.f32.gmra.mrb[2].mxu1 %vm443_vm1, %v2976_v57 }
 0x118   : > { %2320 = vmatprep.mubr.msk.f32.mxu1 %vm443_vm1, %v2982_v59  ;;  %2445 = vmatpush3.bf16.msra.mxu1 %v2442_v45 }
 0x119   : > { %2413 = vmatpush3.bf16.msra.mxu0 %v2410_v49  ;;  %2447 = vmatprep.subr.bf16.mxu1 %v2446_v55 }
 0x11a   : > { %2241 = vmatmul.mubr.msk.f32.gmra.mrb[12].mxu0 %vm443_vm1, %v488_v60  ;;  %2415 = vmatprep.subr.bf16.mxu0 %v2414_v58 }
 0x11b   : > { %2243 = vmatprep.mubr.msk.f32.mxu0 %vm443_vm1, %v489_v61  ;;  %2321 = vmatmul.mubr.msk.f32.gmra.mrb[4].mxu1 %vm443_vm1, %v2987_v62 }
 0x11c   : > { %2323 = vmatprep.mubr.msk.f32.mxu1 %vm443_vm1, %v2992_v63 }
 0x11e   : > { %2244 = vmatmul.mubr.msk.f32.gmra.mrb[14].mxu0 %vm443_vm1, %v490_v1 }
 0x11f   : > { %2324 = vmatmul.mubr.msk.f32.gmra.mrb[6].mxu1 %vm443_vm1, %v2997_v2  ;;  %2254 = vmatprep.mubr.msk.f32.mxu0 %vm443_vm1, %v766_v0 }
 0x120   : > { %2334 = vmatprep.mubr.msk.f32.mxu1 %vm443_vm1, %v2949_v47 }
 0x122   : > { %2255 = vmatmul.mubr.msk.f32.vlgmr.msra.gmra.mrb[8].mxu0 %vm443_vm1, %v1216_v41 }
 0x123   : > { %2257 = vmatprep.mubr.msk.f32.mxu0 %vm443_vm1, %v2951_v48  ;;  %2335 = vmatmul.mubr.msk.f32.vlgmr.msra.gmra.mrb[0].mxu1 %vm443_vm1, %v2970_v54 }
 0x124   : > { %2449 = vmatpush3.bf16.msra.mxu1 %v2446_v55  ;;  %2337 = vmatprep.mubr.msk.f32.mxu1 %vm443_vm1, %v2974_v56 }
 0x125   : > { %2451 = vmatprep.subr.bf16.mxu1 %v2450_v7  ;;  %2417 = vmatpush3.bf16.msra.mxu0 %v2414_v58 }
 0x126   : > { %2258 = vmatmul.mubr.msk.f32.gmra.mrb[10].mxu0 %vm443_vm1, %v2960_v51  ;;  %2419 = vmatprep.subr.bf16.mxu0 %v2418_v8 }
 0x127   : > { %2260 = vmatprep.mubr.msk.f32.mxu0 %vm443_vm1, %v2976_v57  ;;  %2338 = vmatmul.mubr.msk.f32.gmra.mrb[2].mxu1 %vm443_vm1, %v488_v60 }
 0x128   : > { %2340 = vmatprep.mubr.msk.f32.mxu1 %vm443_vm1, %v489_v61  ;;  %2453 = vmatpush3.bf16.msra.mxu1 %v2450_v7 }
 0x129   : > { %2421 = vmatpush3.bf16.msra.mxu0 %v2418_v8  ;;  %2455 = vmatprep.subr.bf16.mxu1 %v2454_v11 }
 0x12a   : > { %2261 = vmatmul.mubr.msk.f32.gmra.mrb[12].mxu0 %vm443_vm1, %v2982_v59 }
 0x12b   : > { %2263 = vmatprep.mubr.msk.f32.mxu0 %vm443_vm1, %v2987_v62  ;;  %2341 = vmatmul.mubr.msk.f32.gmra.mrb[4].mxu1 %vm443_vm1, %v490_v1 }
 0x12c   : > { %2343 = vmatprep.mubr.msk.f32.mxu1 %vm443_vm1, %v1373_v12 }
 0x12e   : > { %2264 = vmatmul.mubr.msk.f32.gmra.mrb[14].mxu0 %vm443_vm1, %v2992_v63 }
 0x12f   : > { %2274 = vmatprep.mubr.msk.f32.mxu0 %vm443_vm1, %v2942_v44  ;;  %2344 = vmatmul.mubr.msk.f32.gmra.mrb[6].mxu1 %vm443_vm1, %v1374_v13 }
 0x130   : > { %2354 = vmatprep.mubr.msk.f32.mxu1 %vm443_vm1, %v2880_v25  ;;  %v1839_v25 = vpop.permute.xlu1 %1838 }
 0x132   : > { %2275 = vmatmul.mubr.msk.f32.vlgmr.msra.gmra.mrb[8].mxu0 %vm443_vm1, %v2949_v47 }
 0x133   : > { %2277 = vmatprep.mubr.msk.f32.mxu0 %vm443_vm1, %v2970_v54  ;;  %2355 = vmatmul.mubr.msk.f32.vlgmr.msra.gmra.mrb[0].mxu1 %vm443_vm1, %v2893_v30 }
 0x134   : > { %2457 = vmatpush3.bf16.msra.mxu1 %v2454_v11  ;;  %2357 = vmatprep.mubr.msk.f32.mxu1 %vm443_vm1, %v2900_v33  ;;  %v1841_v30 = vpop.permute.xlu1 %1840  ;;  %v1837_v33 = vpop.permute.xlu0 %1836 }
 0x135   : > { %2459 = vmatprep.subr.bf16.mxu1 %v2458_v16 }
 0x136   : > { %2278 = vmatmul.mubr.msk.f32.gmra.mrb[10].mxu0 %vm443_vm1, %v2974_v56 }
 0x137   : > { %2280 = vmatprep.mubr.msk.f32.mxu0 %vm443_vm1, %v488_v60  ;;  %2358 = vmatmul.mubr.msk.f32.gmra.mrb[2].mxu1 %vm443_vm1, %v2906_v34 }
 0x138   : > { %2360 = vmatprep.mubr.msk.f32.mxu1 %vm443_vm1, %v2912_v35  ;;  %2461 = vmatpush3.bf16.msra.mxu1 %v2458_v16  ;;  %v1845_v39 = vpop.permute.xlu1 %1844  ;;  %v1843_v41 = vpop.permute.xlu0 %1842 }
 0x13a   : > { %2281 = vmatmul.mubr.msk.f32.gmra.mrb[12].mxu0 %vm443_vm1, %v489_v61 }
 0x13b   : > { %2283 = vmatprep.mubr.msk.f32.mxu0 %vm443_vm1, %v490_v1  ;;  %2361 = vmatmul.mubr.msk.f32.gmra.mrb[4].mxu1 %vm443_vm1, %v2918_v37 }
 0x13c   : > { %2363 = vmatprep.mubr.msk.f32.mxu1 %vm443_vm1, %v2924_v38  ;;  %v1847_v50 = vpop.permute.xlu0 %1846 }
 0x13e   : > { %2284 = vmatmul.mubr.msk.f32.gmra.mrb[14].mxu0 %vm443_vm1, %v1373_v12 }
 0x13f   : > { %2364 = vmatmul.mubr.msk.f32.gmra.mrb[6].mxu1 %vm443_vm1, %v1524_v17 }
 0x140   : > { %2374 = vmatprep.mubr.msk.f32.mxu1 %vm443_vm1, %v2951_v48  ;;  %v1849_v48 = vpop.permute.xlu1 %1848 }
 0x143   : > { %2375 = vmatmul.mubr.msk.f32.vlgmr.msra.gmra.mrb[0].mxu1 %vm443_vm1, %v2960_v51 }
 0x144   : > { %2377 = vmatprep.mubr.msk.f32.mxu1 %vm443_vm1, %v2976_v57 }
 0x147   : > { %2378 = vmatmul.mubr.msk.f32.gmra.mrb[2].mxu1 %vm443_vm1, %v2982_v59 }
 0x148   : > { %2380 = vmatprep.mubr.msk.f32.mxu1 %vm443_vm1, %v2987_v62 }
 0x14b   : > { %2381 = vmatmul.mubr.msk.f32.gmra.mrb[4].mxu1 %vm443_vm1, %v2992_v63 }
 0x14c   : > { %2383 = vmatprep.mubr.msk.f32.mxu1 %vm443_vm1, %v2997_v2 }
 0x14f   : > { %2384 = vmatmul.mubr.msk.f32.gmra.mrb[6].mxu1 %vm443_vm1, %v1674_v18 }
 0x205   : > { %v2276_v19 = vpop.f32.mrb[8].mxu0 }
 0x206   : > { %v1019_v20 = vpop.f32.mrb[9].mxu0 }
 0x209   : > { %v2279_v21 = vpop.f32.mrb[10].mxu0 }
 0x20a   : > { %v1029_v22 = vpop.f32.mrb[11].mxu0 }
 0x20d   : > { %v2282_v23 = vpop.f32.mrb[12].mxu0 }
 0x20e   : > { %v1039_v24 = vpop.f32.mrb[13].mxu0 }
 0x211   : > { %v2285_v26 = vpop.f32.mrb[14].mxu0 }
 0x212   : > { %v1049_v28 = vpop.f32.mrb[15].mxu0 }
 0x216   : > { %v2376_v29 = vpop.f32.mrb[0].mxu1 }
 0x217   : > { %v2462_v31 = vadd.f32 %v2376_v29, %v2276_v19  ;;  %v1770_v32 = vpop.f32.mrb[1].mxu1 }
 0x218   : > { %v2463_v34 = vadd.f32 %v1770_v32, %v1019_v20 }
 0x219   : > { %1819 = vst.msk [vmem:[%s3095_s12 + $0x8] sm:$0xff] %vm1817_vm2, %v2462_v31 }
 0x21a   : > { %1818 = vst.msk [vmem:[%s3095_s12] sm:$0xff] %vm1817_vm2, %v2463_v34  ;;  %v2379_v35 = vpop.f32.mrb[2].mxu1 }
 0x21b   : > { %1860 = vst.msk [vmem:[%s3095_s12 + $0x8] sm:$0xff] %vm1858_vm3, %v1837_v33  ;;  %1859 = vst.msk [vmem:[%s3095_s12] sm:$0xff] %vm1858_vm3, %v1835_v27  ;;  %v2464_v36 = vadd.f32 %v2379_v35, %v2279_v21  ;;  %v1780_v37 = vpop.f32.mrb[3].mxu1 }
 0x21c   : > { %v2465_v38 = vadd.f32 %v1780_v37, %v1029_v22 }
 0x21d   : > { %1821 = vst.msk [vmem:[%s3095_s12 + $0x18] sm:$0xff] %vm1817_vm2, %v2464_v36 }
 0x21e   : > { %1820 = vst.msk [vmem:[%s3095_s12 + $0x10] sm:$0xff] %vm1817_vm2, %v2465_v38  ;;  %v2382_v40 = vpop.f32.mrb[4].mxu1 }
 0x21f   : > { %1862 = vst.msk [vmem:[%s3095_s12 + $0x18] sm:$0xff] %vm1858_vm3, %v1841_v30  ;;  %1861 = vst.msk [vmem:[%s3095_s12 + $0x10] sm:$0xff] %vm1858_vm3, %v1839_v25  ;;  %v2466_v42 = vadd.f32 %v2382_v40, %v2282_v23  ;;  %v1790_v43 = vpop.f32.mrb[5].mxu1 }
 0x220   : > { %v2467_v44 = vadd.f32 %v1790_v43, %v1039_v24 }
 0x221   : > { %1823 = vst.msk [vmem:[%s3095_s12 + $0x28] sm:$0xff] %vm1817_vm2, %v2466_v42 }
 0x222   : > { %1822 = vst.msk [vmem:[%s3095_s12 + $0x20] sm:$0xff] %vm1817_vm2, %v2467_v44  ;;  %v2385_v45 = vpop.f32.mrb[6].mxu1 }
 0x223   : > { %1864 = vst.msk [vmem:[%s3095_s12 + $0x28] sm:$0xff] %vm1858_vm3, %v1845_v39  ;;  %1863 = vst.msk [vmem:[%s3095_s12 + $0x20] sm:$0xff] %vm1858_vm3, %v1843_v41  ;;  %v2468_v46 = vadd.f32 %v2385_v45, %v2285_v26  ;;  %v1800_v47 = vpop.f32.mrb[7].mxu1 }
 0x224   : > { %v2469_v49 = vadd.f32 %v1800_v47, %v1049_v28 }
 0x225   : > { %1825 = vst.msk [vmem:[%s3095_s12 + $0x38] sm:$0xff] %vm1817_vm2, %v2468_v46 }
 0x226   : > { %1824 = vst.msk [vmem:[%s3095_s12 + $0x30] sm:$0xff] %vm1817_vm2, %v2469_v49 }
 0x227   : > { %1866 = vst.msk [vmem:[%s3095_s12 + $0x38] sm:$0xff] %vm1858_vm3, %v1849_v48  ;;  %1865 = vst.msk [vmem:[%s3095_s12 + $0x30] sm:$0xff] %vm1858_vm3, %v1847_v50 }
 0x228   : > { %2581 = shalt.err (!%p2578_p3)
}
 0x229   : > { %s2582_s29 = scalar_lea.hbm %s3126_s25, 1024  ;;  %s2586_s11 = scalar_lea.hbm %s3188_s6, 2048 }
 0x22a   : > { %p2583_p4 = scmp.ne.s32.totalorder %s3126_s25, %s2582_s29  ;;  %p2587_p9 = scmp.lt.u32.totalorder %s3126_s25, %s3188_s6 }
 0x22b   : > { %p2588_p10 = scmp.lt.u32.totalorder %s2586_s11, %s2582_s29  ;;  %p2590_p12 = scmp.lt.u32.totalorder %s2582_s29, %s3126_s25 }
 0x22c   : > { %p2584_p7 = pnand %p2583_p4, %p2709_p5 }
 0x22d   : > { %p2589_p11 = por %p2588_p10, %p2587_p9 }
 0x22e   : > { %p2585_p8 = pneg %p2584_p7 }
 0x22f   : > { %p2591_p13 = por %p2590_p12, %p2589_p11 }
 0x231   : > { %p2592_p0 = pnand %p2591_p13, %p2585_p8 }
 0x233   : > { %2595 = shalt.err (!%p2592_p0)
}
 0x234   : > { %s2635_s15 = smov 128  }
 0x235   : > { %2526 = dma.vmem_to_hbm [thread:$0]  (%p2709_p5), %s3130_s14, 1024, %s3126_s25, %s3140_s18, %s2635_s15, %s2635_s15, %s2633_s16  }
 0x236 PF: > { %p2532_p1 = scmp.ge.s32.totalorder %s2630_s24, 2  ;;  %s1896_s17 = sand.u32 1, %s2618_s21  }
 0x237   : > { %s1897_s19 = scalar_lea.sflag [#allocation4], %s1896_s17 }
 0x238   : > { %p2529_p2 = pnand %p2532_p1, %p2713_p6 }
 0x23a   : > { %2613 = dma.done.wait (!%p2529_p2), %s1897_s19, 1024  }
 0x23b   : > { %2615 = vsyncadd (!%p2529_p2), %s1897_s19, 4294966272  ;;  %p16_p3 = scmp.ge.s32.totalorder %s2696_s27, 4   ;;  %s3191_s21 = smov %s2622_s22 }
 0x23c   : > { %s3192_s22 = smov %s2626_s23  ;;  %s3193_s23 = smov %s2707_s30 }
 0x23d   : > { %s3194_s24 = smov %s2696_s27  ;;  %18 = sbr.rel (!%p16_p3) target bundleno = 3 (0x3), region = 89 }
 0x244   :  { %1902 = vsyncpa [#allocation4], 1 }
 0x245   :  { %1904 = vsyncpa [#allocation4 + $0x1], 1 }

</bundles_post_ra>
